<compile_context>
chip_gen: v7x
topology: tpu7x:2x2x1
jax: 0.10.0
libtpu: 0.0.40
codegen_flags: <defaults>
</compile_context>

<pallas_src>
import functools

import jax
import jax.numpy as jnp
from jax.experimental import pallas as pl
from jax.experimental.pallas import tpu as pltpu


def _round_up(x, m):
    return ((x + m - 1) // m) * m


def deepfm_kernel(x_flat_ref, lin_ref, ws_ref, b1_ref, w2_ref, b2_ref,
                  w3_ref, out_ref, *, h1_dim):
    """One batch tile of DeepFM: FM pairwise + DNN tower + sigmoid.

    lin_ref already holds (sum of linear weights + fm_bias + b3) per row.
    ws_ref is the horizontally fused [w1 | S] weight (F*E, H1 + E), bf16.
    """
    flat_bf = x_flat_ref[...]                          # (TB, F*E) bf16, lane-dense
    flat_f32 = flat_bf.astype(jnp.float32)             # exact upcast (v5e-safe VPU)

    # ---- one MXU pass over K = F*E for both the DNN first layer and the
    #      per-field embedding sum (FM pairwise term) ----
    fused = jnp.dot(flat_bf, ws_ref[...],
                    preferred_element_type=jnp.float32)  # (TB, H1 + E)
    h1_pre = fused[:, :h1_dim]                           # (TB, H1)
    sum_emb = fused[:, h1_dim:]                          # (TB, E)

    # ---- DNN tower ----
    h1 = jnp.maximum(h1_pre + b1_ref[...], 0.0)                               # (TB, H1)
    h2 = jnp.maximum(
        jnp.dot(h1.astype(jnp.bfloat16), w2_ref[...],
                preferred_element_type=jnp.float32) + b2_ref[...], 0.0)       # (TB, H2)

    # ---- FM pairwise (+ final DNN layer) with a single combined lane reduce
    #      for the two narrow operands; the F*E-wide sum-of-squares stays a
    #      separate reduce since its width can exceed 128 lanes in general ----
    combined = jnp.concatenate(
        [0.5 * sum_emb * sum_emb, h2 * w3_ref[...]], axis=-1)                 # (TB, E+H2)
    pos = jnp.sum(combined, axis=-1, keepdims=True)                           # (TB, 1)
    sum_of_sq = jnp.sum(flat_f32 * flat_f32, axis=-1, keepdims=True)          # (TB, 1)

    out_ref[...] = jax.nn.sigmoid(lin_ref[...] + pos - 0.5 * sum_of_sq)


@jax.jit
def deepfm_forward(X, y, params):
    """X: (B, F) int32 field-local ids; y: (B,) float32 labels."""
    emb_table = params["emb_table"]        # (V_total, E) f32 master copy
    lin_table = params["lin_table"]        # (V_total,)  f32
    offsets = params["offsets"]            # (F,) int32 per-field vocab offsets

    B, F = X.shape
    E = emb_table.shape[1]
    H1 = params["w1"].shape[1]
    H2 = params["w2"].shape[1]

    # ---- batch tiling: even number of grid steps (megacore on v7x), padding
    #      waste <= tb-1 rows because tb tracks ceil(B / n_steps) ----
    batch_tile = 1024
    n_steps = max(2, -(-B // batch_tile))
    if n_steps % 2:
        n_steps += 1
    tb = _round_up(-(-B // n_steps), 8)
    b_pad = n_steps * tb
    grid = (n_steps,)

    # ---- glue: pad only the tiny index matrix, then gather directly into the
    #      padded, lane-dense bf16 slab (no pad copy of the big tensor) ----
    gidx = X + offsets[None, :]                                            # (B, F)
    if b_pad != B:
        gidx = jnp.pad(gidx, ((0, b_pad - B), (0, 0)))                     # index 0 is valid
    x_flat = jnp.take(emb_table, gidx, axis=0).reshape(b_pad, F * E)
    x_flat = x_flat.astype(jnp.bfloat16)                                   # (b_pad, F*E) bf16
    # FM linear sum + fm_bias + b3 folded into a single (b_pad, 1) stream.
    lin = (jnp.sum(jnp.take(lin_table, gidx, axis=0), axis=-1, keepdims=True)
           + params["fm_bias"].reshape(()) + params["b3"].reshape(()))     # (b_pad, 1) f32

    # ---- weights: fuse [w1 | S] so the K=F*E matmul runs once per tile ----
    s_mat = jnp.tile(jnp.eye(E, dtype=jnp.bfloat16), (F, 1))               # (F*E, E)
    w1 = params["w1"].astype(jnp.bfloat16)                                  # (F*E, H1)
    ws = jnp.concatenate([w1, s_mat], axis=1)                               # (F*E, H1+E)
    w2 = params["w2"].astype(jnp.bfloat16)                                  # (H1, H2)
    w3_row = params["w3"].reshape(1, H2)                                    # (1, H2) f32
    b1 = params["b1"]                                                       # (1, H1) f32
    b2 = params["b2"]                                                       # (1, H2) f32

    def tiled(shape):
        return pl.BlockSpec(shape, lambda i: (i, 0))

    def resident(shape):
        return pl.BlockSpec(shape, lambda i: (0, 0))

    cost = pl.CostEstimate(
        flops=2 * b_pad * (F * E * (H1 + E) + H1 * H2) + 6 * b_pad * (F * E + E + H2),
        transcendentals=b_pad,
        bytes_accessed=(x_flat.size * 2 + lin.size * 4 + b_pad * 4
                        + ws.size * 2 + w2.size * 2
                        + (w3_row.size + b1.size + b2.size) * 4),
    )

    y_pred = pl.pallas_call(
        functools.partial(deepfm_kernel, h1_dim=H1),
        out_shape=jax.ShapeDtypeStruct((b_pad, 1), jnp.float32),
        grid=grid,
        in_specs=[
            tiled((tb, F * E)),        # x_flat  (pipelined per tile)
            tiled((tb, 1)),            # lin sum + biases (pipelined per tile)
            resident((F * E, H1 + E)), # fused [w1 | S]
            resident((1, H1)),         # b1
            resident((H1, H2)),        # w2 (bf16)
            resident((1, H2)),         # b2
            resident((1, H2)),         # w3 (as a row)
        ],
        out_specs=tiled((tb, 1)),
        compiler_params=pltpu.CompilerParams(
            dimension_semantics=("parallel",),
            vmem_limit_bytes=32 * 1024 * 1024,
        ),
        cost_estimate=cost,
    )(x_flat, lin, ws, b1, w2, b2, w3_row)

    y_pred = y_pred[:B]
    return {"y_true": y.reshape(y_pred.shape), "y_pred": y_pred}


def init_params(key, num_fields, vocab_per_field, emb_size, hidden=(32, 16)):
    ks = jax.random.split(key, 8)
    v_total = num_fields * vocab_per_field
    input_dim = num_fields * emb_size
    h1, h2 = hidden
    scale = 0.1
    return {
        "emb_table": scale * jax.random.normal(ks[0], (v_total, emb_size), jnp.float32),
        "lin_table": scale * jax.random.normal(ks[1], (v_total,), jnp.float32),
        "offsets": jnp.arange(num_fields, dtype=jnp.int32) * vocab_per_field,
        "fm_bias": jnp.zeros((1, 1), jnp.float32),
        "w1": scale * jax.random.normal(ks[2], (input_dim, h1), jnp.float32),
        "b1": jnp.zeros((1, h1), jnp.float32),
        "w2": scale * jax.random.normal(ks[3], (h1, h2), jnp.float32),
        "b2": jnp.zeros((1, h2), jnp.float32),
        "w3": scale * jax.random.normal(ks[4], (h2, 1), jnp.float32),
        "b3": jnp.zeros((1, 1), jnp.float32),
    }


def reference_forward(X, y, params):
    """Pure-JAX reference mirroring the kernel's bf16 rounding (inputs, w1, w2, h1)."""
    B, F = X.shape
    E = params["emb_table"].shape[1]
    gidx = X + params["offsets"][None, :]
    flat = jnp.take(params["emb_table"], gidx, axis=0).reshape(B, F * E)
    flat = flat.astype(jnp.bfloat16).astype(jnp.float32)       # same rounding as kernel path
    x_lin = jnp.take(params["lin_table"], gidx, axis=0)

    lin = jnp.sum(x_lin, axis=-1, keepdims=True) + params["fm_bias"][0, 0]
    emb = flat.reshape(B, F, E)
    s = jnp.sum(emb, axis=1)
    sq = jnp.sum(emb * emb, axis=1)
    inter = 0.5 * jnp.sum(s * s - sq, axis=-1, keepdims=True)

    w1 = params["w1"].astype(jnp.bfloat16).astype(jnp.float32)
    w2 = params["w2"].astype(jnp.bfloat16).astype(jnp.float32)
    h1 = jnp.maximum(
        jnp.dot(flat, w1, precision=jax.lax.Precision.HIGHEST) + params["b1"], 0.0)
    h1 = h1.astype(jnp.bfloat16).astype(jnp.float32)
    h2 = jnp.maximum(
        jnp.dot(h1, w2, precision=jax.lax.Precision.HIGHEST) + params["b2"], 0.0)
    dnn = jnp.dot(h2, params["w3"], precision=jax.lax.Precision.HIGHEST) + params["b3"]
    return jax.nn.sigmoid(lin + inter + dnn)


if __name__ == "__main__":
    B, F, E, V = 8, 8, 5, 10   # batch, num fields, emb size, vocab per field

    key = jax.random.PRNGKey(0)
    k_params, k_x, k_y = jax.random.split(key, 3)

    params = init_params(k_params, num_fields=F, vocab_per_field=V, emb_size=E)
    X = jax.random.randint(k_x, (B, F), 0, V, dtype=jnp.int32)
    y = jax.random.bernoulli(k_y, 0.5, (B,)).astype(jnp.float32)

    out = deepfm_forward(X, y, params)
    jax.block_until_ready(out)

    ref = reference_forward(X, y, params)
    assert out["y_pred"].shape == (B, 1)
    assert out["y_true"].shape == (B, 1)
    assert jnp.allclose(out["y_pred"], ref, atol=5e-3, rtol=5e-3), (
        float(jnp.max(jnp.abs(out["y_pred"] - ref))))

    print("KERNEL_OK")
</pallas_src>

<mosaic_0001>
module attributes {stable_mosaic.version = 11 : i64} {
  func.func @deepfm_kernel(%arg0: i32, %arg1: memref<8x40xbf16, #tpu.memory_space<vmem>>, %arg2: memref<8x1xf32, #tpu.memory_space<vmem>>, %arg3: memref<40x37xbf16, #tpu.memory_space<vmem>>, %arg4: memref<1x32xf32, #tpu.memory_space<vmem>>, %arg5: memref<32x16xbf16, #tpu.memory_space<vmem>>, %arg6: memref<1x16xf32, #tpu.memory_space<vmem>>, %arg7: memref<1x16xf32, #tpu.memory_space<vmem>>, %arg8: memref<8x1xf32, #tpu.memory_space<vmem>>) attributes {dimension_semantics = [#tpu.dimension_semantics<parallel>], iteration_bounds = array<i64: 2>, scalar_prefetch = 0 : i64, scratch_operands = 0 : i64, tpu.core_type = #tpu.core_type<tc>, window_params = [{transform_indices = @transform_0, window_bounds = array<i64: 8, 40>}, {transform_indices = @transform_1, window_bounds = array<i64: 8, 1>}, {pipeline_mode = #tpu.pipeline_mode<synchronous>, transform_indices = @transform_2, window_bounds = array<i64: 40, 37>}, {pipeline_mode = #tpu.pipeline_mode<synchronous>, transform_indices = @transform_3, window_bounds = array<i64: 1, 32>}, {pipeline_mode = #tpu.pipeline_mode<synchronous>, transform_indices = @transform_4, window_bounds = array<i64: 32, 16>}, {pipeline_mode = #tpu.pipeline_mode<synchronous>, transform_indices = @transform_5, window_bounds = array<i64: 1, 16>}, {pipeline_mode = #tpu.pipeline_mode<synchronous>, transform_indices = @transform_6, window_bounds = array<i64: 1, 16>}, {transform_indices = @transform_7, window_bounds = array<i64: 8, 1>}]} {
    %c0 = arith.constant 0 : index
    %c0_0 = arith.constant 0 : index
    %0 = vector.load %arg1[%c0, %c0_0] : memref<8x40xbf16, #tpu.memory_space<vmem>>, vector<8x40xbf16>
    %1 = arith.extf %0 : vector<8x40xbf16> to vector<8x40xf32>
    %c0_1 = arith.constant 0 : index
    %c0_2 = arith.constant 0 : index
    %2 = vector.load %arg3[%c0_1, %c0_2] : memref<40x37xbf16, #tpu.memory_space<vmem>>, vector<40x37xbf16>
    %cst = arith.constant dense<0.000000e+00> : vector<8x37xf32>
    %3 = tpu.matmul %0, %2, %cst {dimension_numbers = #tpu.dot_dimension_numbers<[1], [0], [0], [1], [0, 0, 1, 1], [], []>} : vector<8x40xbf16>, vector<40x37xbf16>, vector<8x37xf32> -> vector<8x37xf32>
    %4 = vector.extract_strided_slice %3 {offsets = [0, 0], sizes = [8, 32], strides = [1, 1]} : vector<8x37xf32> to vector<8x32xf32>
    %5 = vector.extract_strided_slice %3 {offsets = [0, 32], sizes = [8, 5], strides = [1, 1]} : vector<8x37xf32> to vector<8x5xf32>
    %c0_3 = arith.constant 0 : index
    %c0_4 = arith.constant 0 : index
    %6 = vector.load %arg4[%c0_3, %c0_4] : memref<1x32xf32, #tpu.memory_space<vmem>>, vector<1x32xf32>
    %7 = vector.broadcast %6 : vector<1x32xf32> to vector<8x32xf32>
    %8 = arith.addf %4, %7 : vector<8x32xf32>
    %cst_5 = arith.constant 0.000000e+00 : f32
    %9 = vector.broadcast %cst_5 : f32 to vector<8x32xf32>
    %10 = arith.maximumf %8, %9 : vector<8x32xf32>
    %11 = arith.truncf %10 : vector<8x32xf32> to vector<8x32xbf16>
    %c0_6 = arith.constant 0 : index
    %c0_7 = arith.constant 0 : index
    %12 = vector.load %arg5[%c0_6, %c0_7] : memref<32x16xbf16, #tpu.memory_space<vmem>>, vector<32x16xbf16>
    %cst_8 = arith.constant dense<0.000000e+00> : vector<8x16xf32>
    %13 = tpu.matmul %11, %12, %cst_8 {dimension_numbers = #tpu.dot_dimension_numbers<[1], [0], [0], [1], [0, 0, 1, 1], [], []>} : vector<8x32xbf16>, vector<32x16xbf16>, vector<8x16xf32> -> vector<8x16xf32>
    %c0_9 = arith.constant 0 : index
    %c0_10 = arith.constant 0 : index
    %14 = vector.load %arg6[%c0_9, %c0_10] : memref<1x16xf32, #tpu.memory_space<vmem>>, vector<1x16xf32>
    %15 = vector.broadcast %14 : vector<1x16xf32> to vector<8x16xf32>
    %16 = arith.addf %13, %15 : vector<8x16xf32>
    %cst_11 = arith.constant 0.000000e+00 : f32
    %17 = vector.broadcast %cst_11 : f32 to vector<8x16xf32>
    %18 = arith.maximumf %16, %17 : vector<8x16xf32>
    %cst_12 = arith.constant 5.000000e-01 : f32
    %19 = vector.broadcast %cst_12 : f32 to vector<8x5xf32>
    %20 = arith.mulf %19, %5 : vector<8x5xf32>
    %21 = arith.mulf %20, %5 : vector<8x5xf32>
    %c0_13 = arith.constant 0 : index
    %c0_14 = arith.constant 0 : index
    %22 = vector.load %arg7[%c0_13, %c0_14] : memref<1x16xf32, #tpu.memory_space<vmem>>, vector<1x16xf32>
    %23 = vector.broadcast %22 : vector<1x16xf32> to vector<8x16xf32>
    %24 = arith.mulf %18, %23 : vector<8x16xf32>
    %25 = tpu.concatenate %21, %24 in 1 : vector<8x5xf32>, vector<8x16xf32> -> vector<8x21xf32>
    %cst_15 = arith.constant dense<0.000000e+00> : vector<8xf32>
    %26 = vector.multi_reduction <add>, %25, %cst_15 [1] : vector<8x21xf32> to vector<8xf32>
    %27 = vector.shape_cast %26 : vector<8xf32> to vector<8x1xf32>
    %28 = arith.mulf %1, %1 : vector<8x40xf32>
    %cst_16 = arith.constant dense<0.000000e+00> : vector<8xf32>
    %29 = vector.multi_reduction <add>, %28, %cst_16 [1] : vector<8x40xf32> to vector<8xf32>
    %30 = vector.shape_cast %29 : vector<8xf32> to vector<8x1xf32>
    %c0_17 = arith.constant 0 : index
    %c0_18 = arith.constant 0 : index
    %31 = vector.load %arg2[%c0_17, %c0_18] : memref<8x1xf32, #tpu.memory_space<vmem>>, vector<8x1xf32>
    %32 = arith.addf %31, %27 : vector<8x1xf32>
    %cst_19 = arith.constant 5.000000e-01 : f32
    %33 = vector.broadcast %cst_19 : f32 to vector<8x1xf32>
    %34 = arith.mulf %33, %30 : vector<8x1xf32>
    %35 = arith.subf %32, %34 : vector<8x1xf32>
    %36 = arith.negf %35 : vector<8x1xf32>
    %37 = math.exp %36 : vector<8x1xf32>
    %cst_20 = arith.constant 1.000000e+00 : f32
    %38 = vector.broadcast %cst_20 : f32 to vector<8x1xf32>
    %39 = arith.addf %38, %37 : vector<8x1xf32>
    %40 = arith.divf %38, %39 : vector<8x1xf32>
    %c0_21 = arith.constant 0 : index
    %c0_22 = arith.constant 0 : index
    %41 = vector.load %arg8[%c0_21, %c0_22] : memref<8x1xf32, #tpu.memory_space<vmem>>, vector<8x1xf32>
    tpu.vector_store %arg8[%c0_21, %c0_22], %40 {strides = array<i32>} : memref<8x1xf32, #tpu.memory_space<vmem>>, vector<8x1xf32>,
    return
  }
  func.func @transform_0(%arg0: i32) -> (i32, i32) {
    %c0_i32 = arith.constant 0 : i32
    %c0_i32_0 = arith.constant 0 : i32
    return %arg0, %c0_i32 : i32, i32
  }
  func.func @transform_1(%arg0: i32) -> (i32, i32) {
    %c0_i32 = arith.constant 0 : i32
    %c0_i32_0 = arith.constant 0 : i32
    return %arg0, %c0_i32 : i32, i32
  }
  func.func @transform_2(%arg0: i32) -> (i32, i32) {
    %c0_i32 = arith.constant 0 : i32
    %c0_i32_0 = arith.constant 0 : i32
    %c0_i32_1 = arith.constant 0 : i32
    return %c0_i32, %c0_i32_0 : i32, i32
  }
  func.func @transform_3(%arg0: i32) -> (i32, i32) {
    %c0_i32 = arith.constant 0 : i32
    %c0_i32_0 = arith.constant 0 : i32
    %c0_i32_1 = arith.constant 0 : i32
    return %c0_i32, %c0_i32_0 : i32, i32
  }
  func.func @transform_4(%arg0: i32) -> (i32, i32) {
    %c0_i32 = arith.constant 0 : i32
    %c0_i32_0 = arith.constant 0 : i32
    %c0_i32_1 = arith.constant 0 : i32
    return %c0_i32, %c0_i32_0 : i32, i32
  }
  func.func @transform_5(%arg0: i32) -> (i32, i32) {
    %c0_i32 = arith.constant 0 : i32
    %c0_i32_0 = arith.constant 0 : i32
    %c0_i32_1 = arith.constant 0 : i32
    return %c0_i32, %c0_i32_0 : i32, i32
  }
  func.func @transform_6(%arg0: i32) -> (i32, i32) {
    %c0_i32 = arith.constant 0 : i32
    %c0_i32_0 = arith.constant 0 : i32
    %c0_i32_1 = arith.constant 0 : i32
    return %c0_i32, %c0_i32_0 : i32, i32
  }
  func.func @transform_7(%arg0: i32) -> (i32, i32) {
    %c0_i32 = arith.constant 0 : i32
    %c0_i32_0 = arith.constant 0 : i32
    return %arg0, %c0_i32 : i32, i32
  }
}

</mosaic_0001>

<bundles_post_ra>
// kernel: tile.9
= control target key start
LH: loop header
LB: loop body
LE: loop exit
PB: predicated region body
PF: predicated region fallthrough
CT: control target
= control target key end

     0   :  { %vm84_vm0 = vcmask 1044484   ;;  %s191_s12 = smov 25   ;;  %vm86_vm1 = vcmask 39936   ;;  %s192_s13 = smov 30   ;;  %vm96_vm2 = vcmask 326936   ;;  %vm106_vm3 = vcmask 285936   ;;  %s228_s0 = inlined_call_operand.vmem [shape: bf16[8,5,5], index: 0, kind: input, shape index: {}]   ;;  %s229_s1 = inlined_call_operand.vmem [shape: bf16[40,5], index: 1, kind: output, shape index: {}]  }
   0x1   :  { %v169_v0 = vld [vmem:[%s228_s0 + $0x10] sm:$0xf]  ;;  %v181_v1 = vld [vmem:[%s228_s0 + $0x8] sm:$0xff]   ;;  %v178_v2 = vld [vmem:[%s228_s0] sm:$0xff]   ;;  %s190_s0 = smov 35   ;;  %s193_s14 = smov 20  }
   0x2   :  { %v17_v3 = vunpack.c.l.bf16 %v169_v0  ;;  %v175_v4 = vunpack.c.l.bf16 %v181_v1  ;;  %v176_v5 = vunpack.c.h.bf16 %v181_v1  ;;  %v179_v6 = vunpack.c.l.bf16 %v178_v2  ;;  %s194_s15 = smov 15   ;;  %s195_s16 = smov 10  }
   0x3   :  { %v180_v7 = vunpack.c.h.bf16 %v178_v2  ;;  %s196_s17 = smov 5   ;;  %vm116_vm4 = vcmask 244936   ;;  %vm126_vm5 = vcmask 203936   ;;  %vm136_vm6 = vcmask 162936  }
   0x4   :  { %20 = vst [vmem:[#allocation1 + $0x20] sm:$0xff] %v17_v3  ;;  %36 = vst [vmem:[#allocation1 + $0x18] sm:$0xff] %v176_v5  ;;  %vm146_vm7 = vcmask 121936   ;;  %vm156_vm8 = vcmask 80936   ;;  %v197_v40 = vmov 0.0  }
   0x5   :  { %52 = vst [vmem:[#allocation1 + $0x10] sm:$0xff] %v175_v4  ;;  %80 = vst [vmem:[#allocation1] sm:$0xff] %v179_v6 }
   0x6   :  { %67 = vst [vmem:[#allocation1 + $0x8] sm:$0xff] %v180_v7 }
   0xb   :  { %v91_v8 = vld [vmem:[#allocation1 + $0x23] sm:$0x10]   ;;  %v111_v9 = vld [vmem:[#allocation1 + $0x21] sm:$0x10]   ;;  %v101_v10 = vld [vmem:[#allocation1 + $0x22] sm:$0x10]  }
   0xc   :  { %v121_v17 = vld [vmem:[#allocation1 + $0x20] sm:$0x10]   ;;  %v131_v21 = vld [vmem:[#allocation1 + $0x1f] sm:$0x10]   ;;  %v141_v23 = vld [vmem:[#allocation1 + $0x1e] sm:$0x10]  }
   0xd   :  { %v89_v11 = vld [vmem:[#allocation1 + $0x7] ss:$8 sm:$0xf]   ;;  %v109_v12 = vld [vmem:[#allocation1 + $0x5] ss:$8 sm:$0xf]  }
   0xe   :  { %v93_v13 = vsel %vm84_vm0, %v91_v8, %v89_v11  ;;  %v113_v14 = vsel %vm84_vm0, %v111_v9, %v109_v12  ;;  %v99_v15 = vld [vmem:[#allocation1 + $0x6] ss:$8 sm:$0xf]   ;;  %v119_v16 = vld [vmem:[#allocation1 + $0x4] ss:$8 sm:$0xf]  }
   0xf   :  { %94 = vrot.lane.b32.xlu0 %v93_v13, %s190_s0  ;;  %114 = vrot.lane.b32.xlu1 %v113_v14, %s191_s12  ;;  %v103_v18 = vsel %vm84_vm0, %v101_v10, %v99_v15  ;;  %v123_v19 = vsel %vm84_vm0, %v121_v17, %v119_v16  ;;  %v129_v20 = vld [vmem:[#allocation1 + $0x3] ss:$8 sm:$0xf]   ;;  %v139_v22 = vld [vmem:[#allocation1 + $0x2] ss:$8 sm:$0xf]  }
  0x10   :  { %v81_v24 = vld [vmem:[#allocation1] ss:$8 sm:$0xf]   ;;  %v133_v26 = vsel %vm84_vm0, %v131_v21, %v129_v20  ;;  %v143_v27 = vsel %vm84_vm0, %v141_v23, %v139_v22  ;;  %v149_v29 = vld [vmem:[#allocation1 + $0x1] ss:$8 sm:$0xf]  }
  0x11   :  { %v83_v25 = vld [vmem:[#allocation1 + $0x1c] sm:$0x10]   ;;  %v151_v30 = vld [vmem:[#allocation1 + $0x1d] sm:$0x10]  }
  0x12   :  { %v85_v28 = vsel %vm84_vm0, %v83_v25, %v81_v24  ;;  %v153_v31 = vsel %vm84_vm0, %v151_v30, %v149_v29 }
  0x13   :  { %104 = vrot.lane.b32.xlu0 %v103_v18, %s192_s13  ;;  %124 = vrot.lane.b32.xlu1 %v123_v19, %s193_s14  ;;  %87 = vst.msk [vmem:[#allocation0] sm:$0x1f] %vm86_vm1, %v85_v28  }
  0x17   :  { %134 = vrot.lane.b32.xlu0 %v133_v26, %s194_s15  ;;  %144 = vrot.lane.b32.xlu1 %v143_v27, %s195_s16 }
  0x1b   :  { %154 = vrot.lane.b32.xlu0 %v153_v31, %s196_s17 }
  0x81   :  { %v95_v32 = vpop.permute.xlu0 %94   ;;  %v115_v33 = vpop.permute.xlu1 %114  }
  0x82   :  { %97 = vst.msk [vmem:[#allocation0] sm:$0x1f] %vm96_vm2, %v95_v32  }
  0x85   :  { %v105_v34 = vpop.permute.xlu0 %104   ;;  %v125_v35 = vpop.permute.xlu1 %124  }
  0x86   :  { %107 = vst.msk [vmem:[#allocation0] sm:$0x1f] %vm106_vm3, %v105_v34  }
  0x87   :  { %117 = vst.msk [vmem:[#allocation0] sm:$0x1f] %vm116_vm4, %v115_v33  }
  0x88   :  { %127 = vst.msk [vmem:[#allocation0] sm:$0x1f] %vm126_vm5, %v125_v35  }
  0x89   :  { %v135_v36 = vpop.permute.xlu0 %134   ;;  %v145_v37 = vpop.permute.xlu1 %144  }
  0x8a   :  { %137 = vst.msk [vmem:[#allocation0] sm:$0x1f] %vm136_vm6, %v135_v36  }
  0x8b   :  { %147 = vst.msk [vmem:[#allocation0] sm:$0x1f] %vm146_vm7, %v145_v37  }
  0x8d   :  { %v155_v38 = vpop.permute.xlu0 %154  }
  0x8e   :  { %157 = vst.msk [vmem:[#allocation0] sm:$0x1f] %vm156_vm8, %v155_v38  }
  0x95   :  { %v162_v39 = vld [vmem:[#allocation0] sm:$0xff] }
  0x96   :  { %v163_v41 = vpack.c.bf16 %v197_v40, %v162_v39 }
  0x98   :  { %165 = vst [vmem:[%s229_s1] sm:$0xf] %v163_v41 }

// kernel: deepfm_forward.1
= control target key start
LH: loop header
LB: loop body
LE: loop exit
PB: predicated region body
PF: predicated region fallthrough
CT: control target
= control target key end

     0   :  { %s664_s24 = smov 0   ;;  %s714_s0 = inlined_call_operand.vmem [shape: bf16[16,40], index: 0, kind: input, shape index: {}]   ;;  %s715_s1 = inlined_call_operand.vmem [shape: f32[16,1], index: 1, kind: input, shape index: {}]   ;;  %s716_s2 = inlined_call_operand.vmem [shape: bf16[40,37], index: 2, kind: input, shape index: {}]   ;;  %s717_s3 = inlined_call_operand.vmem [shape: f32[1,32], index: 3, kind: input, shape index: {}]   ;;  %s718_s4 = inlined_call_operand.vmem [shape: bf16[32,16], index: 4, kind: input, shape index: {}]   ;;  %s719_s5 = inlined_call_operand.vmem [shape: f32[1,16], index: 5, kind: input, shape index: {}]   ;;  %s720_s6 = inlined_call_operand.vmem [shape: f32[1,16], index: 6, kind: input, shape index: {}]   ;;  %s721_s7 = inlined_call_operand.vmem [shape: f32[16,1], index: 7, kind: output, shape index: {}]  }
   0x1 LB: > { %s545_s25 = sadd.s32 4294967295, %s618_s24   ;;  %p549_p0 = scmp.ge.s32.totalorder %s618_s24, 1  ;;  %s618_s24 = sphi %s664_s24, %s17_s24  }
   0x2   : > { %p245_p1 = scmp.lt.s32.totalorder %s618_s24, 3 }
   0x4   : > { %p246_p2 = pnand %p549_p0, %p245_p1 }
   0x5   : > { %v603_v0 = vld [vmem:[%s716_s2] sm:$0xff] (!%p246_p2)   ;;  %v620_v1 = vmov (!%p246_p2), 0.0   ;;  %v604_v2 = vld [vmem:[%s716_s2 + $0x8] sm:$0xff] (!%p246_p2)   ;;  %p279_p3 = scmp.lt.s32.totalorder (!%p246_p2), %s545_s25, 1  ;;  %v605_v3 = vld [vmem:[%s716_s2 + $0x10] ss:$0 sps:$4 sm:$0xff] (!%p246_p2)  }
   0x6   : > { %249 = sbr.rel (%p246_p2) target bundleno = 748 (0x2ec), region = 48  ;;  %573 = vmatprep.subr.bf16.mxu0 (!%p246_p2), %v620_v1  ;;  %583 = vmatprep.subr.bf16.mxu1 (!%p246_p2), %v620_v1  ;;  %vm621_vm0 = vmmov (!%p246_p2), 0   ;;  %vm318_vm1 = vcmask (!%p246_p2), 1043456   ;;  %vm314_vm2 = vcmask (!%p246_p2), 326656   ;;  %v606_v6 = vld [vmem:[%s718_s4] sm:$0xff] (!%p246_p2)   ;;  %v607_v7 = vld [vmem:[%s718_s4 + $0x8] sm:$0xff] (!%p246_p2)  }
   0x7   : > { %574 = vmatpush3.bf16.msra.mxu0 (!%p246_p2), %v603_v0  ;;  %579 = vmatprep.mubr.msk.bf16.mxu0 (!%p246_p2), %vm621_vm0, %v620_v1  ;;  %v320_v4 = vsel (!%p246_p2), %vm318_vm1, %v605_v3, 0  ;;  %v557_v8 = vld [vmem:[%s717_s3] ss:$0 sm:$0xff] (!%p246_p2)  ;;  %vm395_vm3 = vcmask (!%p246_p2), 261120   ;;  %s622_s19 = smov (!%p246_p2), 96   ;;  %s623_s26 = smov (!%p246_p2), 5  }
   0x8   : > { %575 = vmatprep.subr.bf16.mxu0 (!%p246_p2), %v620_v1  ;;  %587 = vmatprep.mubr.msk.bf16.mxu1 (!%p246_p2), %vm621_vm0, %v620_v1  ;;  %v558_v18 = vld [vmem:[%s719_s5] ss:$0 sm:$0xff] (!%p246_p2)  ;;  %vm458_vm4 = vcmask (!%p246_p2), 39936   ;;  %vm460_vm5 = vcmask (!%p246_p2), 171008   ;;  %vm478_vm6 = vcmask (!%p246_p2), 7168  }
   0x9   : > { %584 = vmatpush3.bf16.msra.mxu1 (!%p246_p2), %v606_v6  ;;  %v562_v22 = vld [vmem:[%s720_s6] ss:$0 sm:$0xff] (!%p246_p2) }
   0xa   : > { %585 = vmatprep.subr.bf16.mxu1 (!%p246_p2), %v620_v1 }
   0xb   : > { %576 = vmatpush3.bf16.msra.mxu0 (!%p246_p2), %v604_v2 }
   0xc   : > { %577 = vmatprep.subr.bf16.mxu0 (!%p246_p2), %v620_v1 }
   0xd   : > { %s723_s25 = smov (!%p279_p3, %s545_s25), 1  ;;  %586 = vmatpush3.bf16.msra.mxu1 %v607_v7 }
   0xe   : > { %s550_s9 = sshll.u32 %s723_s25, 2  ;;  %s551_s27 = sshll.u32 %s723_s25, 3 }
   0xf   : > { %s282_s12 = scalar_lea.vmem %s714_s0, %s550_s9  ;;  %578 = vmatpush3.bf16.msra.mxu0 %v320_v4  ;;  %s286_s30 = scalar_lea.vmem %s715_s1, %s551_s27 }
  0x10   : > { %v292_v5 = vld [vmem:[%s282_s12] sm:$0xf]  ;;  %s290_s10 = scalar_lea.vmem %s721_s7, %s551_s27 }
  0x11   : > { %v293_v28 = vunpack.c.l.bf16 %v292_v5  ;;  %v468_v35 = vld [vmem:[%s286_s30] sm:$0xff] }
  0x12   : > { %580 = vmatmul.mubr.msk.bf16.vlgmr.msra.gmra.mrb[0].mxu0 %vm314_vm2, %v292_v5 }
  0x13   : > { %v464_v30 = vmul.f32 %v293_v28, %v293_v28 }
  0x15   : > { %v465_v33 = vsel %vm314_vm2, %v464_v30, 0.0 }
  0xe5   : > { %v356_v9 = vpop.f32.mrb[0].mxu0 }
  0xe6   : > { %v369_v10 = vadd.f32 %v557_v8, %v356_v9  ;;  %v581_v11 = vpop.f32.mrb[1].mxu0  ;;  %v440_v12 = vmul.f32 0.5, %v356_v9 }
  0xe7   : > { %v359_v13 = vpop.f32.mrb[2].mxu0 }
  0xe8   : > { %v370_v14 = vmax.f32 %v369_v10, 0.0  ;;  %v582_v15 = vpop.f32.mrb[3].mxu0  ;;  %v441_v16 = vmul.f32 %v440_v12, %v356_v9 }
  0xea   : > { %v371_v17 = vpack.c.bf16 %v370_v14, %v370_v14  ;;  %451 = vrot.lane.b32.xlu0 %v441_v16, %s622_s19 }
  0xec   : > { %588 = vmatmul.mubr.msk.bf16.vlgmr.msra.gmra.mrb[0].mxu1 %vm395_vm3, %v371_v17 }
 0x15c   : > { %v452_v27 = vpop.permute.xlu0 %451 }
 0x1bf   : > { %v433_v19 = vpop.f32.mrb[0].mxu1 }
 0x1c0   : > { %v434_v20 = vadd.f32 %v558_v18, %v433_v19  ;;  %v589_v21 = vpop.f32.mrb[1].mxu1 }
 0x1c1   : > { %v436_v23 = vpop.f32.mrb[2].mxu1 }
 0x1c2   : > { %v439_v24 = vmax.f32 %v434_v20, 0.0  ;;  %v590_v25 = vpop.f32.mrb[3].mxu1 }
 0x1c4   : > { %v449_v26 = vmul.f32 %v562_v22, %v439_v24 }
 0x1c6   : > { %455 = vrot.lane.b32.xlu0 %v449_v26, %s623_s26 }
 0x238   : > { %v456_v29 = vpop.permute.xlu0 %455 }
 0x239   : > { %v459_v31 = vsel %vm458_vm4, %v452_v27, %v456_v29 }
 0x23a   : > { %v461_v32 = vsel %vm460_vm5, %v459_v31, 0.0 }
 0x23b   : > { %462 = vadd.xlane.f32.xlu1 %v461_v32 }
 0x23f   : > { %466 = vadd.xlane.f32.xlu1 %v465_v33 }
 0x2c8   : > { %v463_v34 = vpop.xlane.xlu1 %462 }
 0x2c9   : > { %v469_v37 = vadd.f32 %v468_v35, %v463_v34 }
 0x2cc   : > { %v467_v36 = vpop.xlane.xlu1 %466 }
 0x2cd   : > { %v470_v38 = vmul.f32 0.5, %v467_v36 }
 0x2cf   : > { %v471_v39 = vsub.f32 %v469_v37, %v470_v38 }
 0x2d1   : > { %v563_v40 = vmul.f32 -1.442695, %v471_v39 }
 0x2d3   : > { %608 = vpow2.f32 %v563_v40 }
 0x2dd   : > { %v609_v41 = vpop.eup %608 }
 0x2de   : > { %v475_v42 = vadd.f32 1.0, %v609_v41 }
 0x2e0   : > { %610 = vrcp.f32 %v475_v42 }
 0x2ea   : > { %v611_v43 = vpop.eup %610 }
 0x2eb   : > { %479 = vst.msk [vmem:[%s290_s10] sm:$0xff] %vm478_vm6, %v611_v43 }
 0x2ec PF: > { %s17_s24 = sadd.s32 1, %s618_s24  }
 0x2ed   : > { %p14_p4 = scmp.ge.s32.totalorder %s17_s24, 4  }
 0x2ef   :  { %16 = sbr.rel (!%p14_p4) target bundleno = 1 (0x1), region = 81 }

</bundles_post_ra>
